<compile_context>
chip_gen: v7x
topology: tpu7x:2x2x1
jax: 0.10.0
libtpu: 0.0.40
codegen_flags: <defaults>
</compile_context>

<pallas_src>
import math

import jax
import jax.numpy as jnp
from jax.experimental import pallas as pl
from jax.experimental.pallas import tpu as pltpu


def _memory_mixer_kernel(a_ref, b_ref, k_ref, v_ref, m_ref, out_ref):
    # a = (1 - fg), b = fg * (2 - fg): precomputed (1, lane) f32 residents.
    a = a_ref[...]
    b = b_ref[...]
    k = k_ref[...].astype(jnp.float32)
    v = v_ref[...].astype(jnp.float32)
    m = m_ref[...].astype(jnp.float32)
    out_ref[...] = (a * (k * v) + b * m).astype(out_ref.dtype)


def _round_up(x, m):
    return (x + m - 1) // m * m


def _choose_layout(total, hidden, max_lane=16384):
    """Return (lane, padded_total) with lane % hidden == 0 and
    padded_total % lane == 0, preferring lane % 128 == 0 (lane-dense stores)."""
    # 1) Largest lane-dense divisor of `total` -> no padding pass needed.
    best_dense = None
    c = hidden
    while c <= max_lane:
        if total % c == 0 and c % 128 == 0:
            best_dense = c
        c += hidden
    if best_dense is not None:
        return best_dense, total
    # 2) Pad the flattened length up to a multiple of lcm(hidden, 128) so the
    #    output last dim is always a large multiple of 128 (no vst.msk).
    lane0 = hidden * 128 // math.gcd(hidden, 128)
    if lane0 <= max_lane:
        lane = lane0
        while lane * 2 <= max_lane and lane * 2 <= total:
            lane *= 2
        return lane, _round_up(total, lane)
    # 3) Degenerate fallback (huge awkward hidden): lane-sparse but correct.
    return hidden, total


def _tile_params():
    """Pick per-operand tile bytes / VMEM limit from the chip generation."""
    try:
        vmem_cap = pltpu.get_tpu_info().vmem_capacity_bytes
    except Exception:  # no hw info available -> be conservative (v7x-sized)
        vmem_cap = 64 * 1024 * 1024
    if vmem_cap >= 96 * 1024 * 1024:
        # v5e / v6e: 128 MiB VMEM -> bigger tiles, amortize per-step overhead.
        return 6 * 1024 * 1024, 96 * 1024 * 1024
    # v7x: 64 MiB VMEM -> 4 MiB tiles (4 streams x 2 bufs = 32 MiB live).
    return 4 * 1024 * 1024, 56 * 1024 * 1024


def mhba_memory_mixer(keys, values, memorys, forget_gate):
    assert keys.shape == values.shape == memorys.shape
    *_, hidden = keys.shape
    assert forget_gate.shape == (hidden,)

    dtype = keys.dtype
    itemsize = jnp.dtype(dtype).itemsize
    total = math.prod(keys.shape)

    lane, padded_total = _choose_layout(total, hidden)
    rows = padded_total // lane
    pad = padded_total - total

    def flat(x):
        x = x.reshape(-1)
        if pad:
            x = jnp.pad(x, (0, pad))
        return x.reshape(rows, lane)

    k2, v2, m2 = flat(keys), flat(values), flat(memorys)

    # Gate coefficients: f32, periodic with period `hidden`, tiled once to
    # lane width; resident across all grid steps.
    fg32 = forget_gate.astype(jnp.float32)
    a2 = jnp.tile(1.0 - fg32, lane // hidden).reshape(1, lane)
    b2 = jnp.tile(fg32 * (2.0 - fg32), lane // hidden).reshape(1, lane)

    target_tile_bytes, vmem_limit = _tile_params()

    # Row tile: sublane-aligned (8 rows/f32, 16/bf16, 32/int8) and sized to
    # ~target_tile_bytes per streamed operand.
    sub = {4: 8, 2: 16, 1: 32}.get(itemsize, 8)
    target_rows = max(sub, (target_tile_bytes // (lane * itemsize)) // sub * sub)
    if rows > target_rows:
        tile_rows = target_rows
    elif rows >= 2 * sub:
        # Ensure >= 2 grid steps so v7x's second TensorCore gets work.
        tile_rows = _round_up((rows + 1) // 2, sub)
    else:
        tile_rows = rows

    grid = (pl.cdiv(rows, tile_rows),)
    row_spec = pl.BlockSpec((tile_rows, lane), lambda i: (i, 0))
    gate_spec = pl.BlockSpec((1, lane), lambda i: (0, 0))

    cost = pl.CostEstimate(
        flops=4 * padded_total,
        transcendentals=0,
        bytes_accessed=4 * padded_total * itemsize + 2 * lane * 4,
    )

    out = pl.pallas_call(
        _memory_mixer_kernel,
        out_shape=jax.ShapeDtypeStruct((rows, lane), dtype),
        grid_spec=pltpu.PrefetchScalarGridSpec(
            num_scalar_prefetch=0,
            grid=grid,
            in_specs=[gate_spec, gate_spec, row_spec, row_spec, row_spec],
            out_specs=row_spec,
        ),
        compiler_params=pltpu.CompilerParams(
            dimension_semantics=("parallel",),
            vmem_limit_bytes=int(vmem_limit),
        ),
        cost_estimate=cost,
        # TODO(synk): if the caller donates `memorys` for in-place recurrent
        # update, add input_output_aliases={4: 0} to drop the extra HBM output.
    )(a2, b2, k2, v2, m2)

    out = out.reshape(-1)
    if pad:
        out = out[:total]
    return out.reshape(keys.shape)


def _reference(keys, values, memorys, forget_gate):
    current_cell = keys * values + forget_gate * memorys
    return (1.0 - forget_gate) * current_cell + forget_gate * memorys


if __name__ == "__main__":
    batch, seq, hidden = 2, 8, 32
    key = jax.random.PRNGKey(0)
    k1, k2, k3, k4 = jax.random.split(key, 4)

    keys = jax.random.normal(k1, (batch, seq, hidden), dtype=jnp.float32)
    values = jax.random.normal(k2, (batch, seq, hidden), dtype=jnp.float32)
    memorys = jax.random.normal(k3, (batch, seq, hidden), dtype=jnp.float32)
    # Deterministic "parameter" init (torch.randn(hidden_dim) in spirit).
    forget_gate = jax.random.normal(k4, (hidden,), dtype=jnp.float32)

    out = mhba_memory_mixer(keys, values, memorys, forget_gate)
    out = jax.block_until_ready(out)

    ref = _reference(keys, values, memorys, forget_gate)
    assert out.shape == (batch, seq, hidden)
    # Folded gate algebra changes rounding order slightly -> modest tolerance.
    assert jnp.allclose(out, ref, atol=1e-5, rtol=1e-5)

    print("KERNEL_OK")
</pallas_src>

<mosaic_0001>
module attributes {stable_mosaic.version = 11 : i64} {
  func.func @_memory_mixer_kernel(%arg0: i32, %arg1: memref<1x512xf32, #tpu.memory_space<vmem>>, %arg2: memref<1x512xf32, #tpu.memory_space<vmem>>, %arg3: memref<1x512xf32, #tpu.memory_space<vmem>>, %arg4: memref<1x512xf32, #tpu.memory_space<vmem>>, %arg5: memref<1x512xf32, #tpu.memory_space<vmem>>, %arg6: memref<1x512xf32, #tpu.memory_space<vmem>>) attributes {dimension_semantics = [#tpu.dimension_semantics<parallel>], iteration_bounds = array<i64: 1>, scalar_prefetch = 0 : i64, scratch_operands = 0 : i64, tpu.core_type = #tpu.core_type<tc>, window_params = [{pipeline_mode = #tpu.pipeline_mode<synchronous>, transform_indices = @transform_0, window_bounds = array<i64: 1, 512>}, {pipeline_mode = #tpu.pipeline_mode<synchronous>, transform_indices = @transform_1, window_bounds = array<i64: 1, 512>}, {transform_indices = @transform_2, window_bounds = array<i64: 1, 512>}, {transform_indices = @transform_3, window_bounds = array<i64: 1, 512>}, {transform_indices = @transform_4, window_bounds = array<i64: 1, 512>}, {transform_indices = @transform_5, window_bounds = array<i64: 1, 512>}]} {
    %c0 = arith.constant 0 : index
    %c0_0 = arith.constant 0 : index
    %0 = vector.load %arg1[%c0, %c0_0] : memref<1x512xf32, #tpu.memory_space<vmem>>, vector<1x512xf32>
    %c0_1 = arith.constant 0 : index
    %c0_2 = arith.constant 0 : index
    %1 = vector.load %arg2[%c0_1, %c0_2] : memref<1x512xf32, #tpu.memory_space<vmem>>, vector<1x512xf32>
    %c0_3 = arith.constant 0 : index
    %c0_4 = arith.constant 0 : index
    %2 = vector.load %arg3[%c0_3, %c0_4] : memref<1x512xf32, #tpu.memory_space<vmem>>, vector<1x512xf32>
    %c0_5 = arith.constant 0 : index
    %c0_6 = arith.constant 0 : index
    %3 = vector.load %arg4[%c0_5, %c0_6] : memref<1x512xf32, #tpu.memory_space<vmem>>, vector<1x512xf32>
    %c0_7 = arith.constant 0 : index
    %c0_8 = arith.constant 0 : index
    %4 = vector.load %arg5[%c0_7, %c0_8] : memref<1x512xf32, #tpu.memory_space<vmem>>, vector<1x512xf32>
    %5 = arith.mulf %2, %3 : vector<1x512xf32>
    %6 = arith.mulf %0, %5 : vector<1x512xf32>
    %7 = arith.mulf %1, %4 : vector<1x512xf32>
    %8 = arith.addf %6, %7 : vector<1x512xf32>
    %c0_9 = arith.constant 0 : index
    %c0_10 = arith.constant 0 : index
    %9 = vector.load %arg6[%c0_9, %c0_10] : memref<1x512xf32, #tpu.memory_space<vmem>>, vector<1x512xf32>
    tpu.vector_store %arg6[%c0_9, %c0_10], %8 {strides = array<i32>} : memref<1x512xf32, #tpu.memory_space<vmem>>, vector<1x512xf32>,
    return
  }
  func.func @transform_0(%arg0: i32) -> (i32, i32) {
    %c0_i32 = arith.constant 0 : i32
    %c0_i32_0 = arith.constant 0 : i32
    %c0_i32_1 = arith.constant 0 : i32
    return %c0_i32, %c0_i32_0 : i32, i32
  }
  func.func @transform_1(%arg0: i32) -> (i32, i32) {
    %c0_i32 = arith.constant 0 : i32
    %c0_i32_0 = arith.constant 0 : i32
    %c0_i32_1 = arith.constant 0 : i32
    return %c0_i32, %c0_i32_0 : i32, i32
  }
  func.func @transform_2(%arg0: i32) -> (i32, i32) {
    %c0_i32 = arith.constant 0 : i32
    %c0_i32_0 = arith.constant 0 : i32
    return %arg0, %c0_i32 : i32, i32
  }
  func.func @transform_3(%arg0: i32) -> (i32, i32) {
    %c0_i32 = arith.constant 0 : i32
    %c0_i32_0 = arith.constant 0 : i32
    return %arg0, %c0_i32 : i32, i32
  }
  func.func @transform_4(%arg0: i32) -> (i32, i32) {
    %c0_i32 = arith.constant 0 : i32
    %c0_i32_0 = arith.constant 0 : i32
    return %arg0, %c0_i32 : i32, i32
  }
  func.func @transform_5(%arg0: i32) -> (i32, i32) {
    %c0_i32 = arith.constant 0 : i32
    %c0_i32_0 = arith.constant 0 : i32
    return %arg0, %c0_i32 : i32, i32
  }
}

</mosaic_0001>

<bundles_post_ra>
// kernel: tpu_custom_call.1
= control target key start
LH: loop header
LB: loop body
LE: loop exit
PB: predicated region body
PF: predicated region fallthrough
CT: control target
= control target key end

     0   :  { %10 = vsyncpa [#allocation3], 0  ;;  %s228_s0 = inlined_call_operand.hbm [shape: f32[1,512], index: 0, kind: input, shape index: {}]   ;;  %s229_s1 = inlined_call_operand.hbm [shape: f32[1,512], index: 1, kind: input, shape index: {}]   ;;  %s230_s2 = inlined_call_operand.vmem [shape: f32[1,512], index: 2, kind: input, shape index: {}]   ;;  %s231_s3 = inlined_call_operand.vmem [shape: f32[1,512], index: 3, kind: input, shape index: {}]   ;;  %s232_s4 = inlined_call_operand.vmem [shape: f32[1,512], index: 4, kind: input, shape index: {}]   ;;  %s233_s5 = inlined_call_operand.hbm [shape: f32[1,512], index: 5, kind: output, shape index: {}]  }
   0x1   :  { %11 = vsyncpa [#allocation6], 0 }
   0x2   :  { %12 = vsyncpa [#allocation4], 0  ;;  %s150_s18 = smov [#allocation2]   ;;  %s151_s20 = smov [#allocation5]  }
   0x3   :  { %s19_s19 = sshll.u32 %s150_s18, 4  ;;  %s29_s21 = sshll.u32 %s151_s20, 4  ;;  %s20_s19 = int_to_ptr.vmem [resolvable:$true] %s19_s19  ;;  %s30_s21 = int_to_ptr.vmem [resolvable:$true] %s29_s21 }
   0x4   :  { %s78_s24 = scalar_lea.hbm %s228_s0, 64 }
   0x5   :  { %p79_p0 = scmp.ne.s32.totalorder %s228_s0, %s78_s24  ;;  %p82_p1 = scmp.lt.u32.totalorder %s78_s24, %s228_s0 }
   0x7   :  { %p84_p2 = pnand %p82_p1, %p79_p0 }
   0x9   :  { %87 = shalt.err (!%p84_p2)
}
   0xa   :  { %s88_s29 = scalar_lea.vmem %s20_s19, 64  ;;  %p93_p4 = scmp.lt.s32.totalorder %s20_s19, %s20_s19 }
   0xb   :  { %p89_p3 = scmp.ne.s32.totalorder %s20_s19, %s88_s29  ;;  %p94_p5 = scmp.lt.s32.totalorder %s88_s29, %s88_s29 }
   0xd   :  { %p95_p6 = por %p94_p5, %p93_p4 }
   0xf   :  { %p96_p7 = pnand %p95_p6, %p89_p3 }
  0x11   :  { %99 = shalt.err (!%p96_p7)
}
  0x12   :  { %22 = dma.hbm_to_vmem [thread:$0]  %s228_s0, 64, %s20_s19, [#allocation3]  }
  0x13   :  { %s100_s9 = scalar_lea.hbm %s229_s1, 64 }
  0x14   :  { %p101_p8 = scmp.ne.s32.totalorder %s229_s1, %s100_s9  ;;  %p104_p9 = scmp.lt.u32.totalorder %s100_s9, %s229_s1 }
  0x16   :  { %p106_p10 = pnand %p104_p9, %p101_p8 }
  0x18   :  { %109 = shalt.err (!%p106_p10)
}
  0x19   :  { %s110_s14 = scalar_lea.vmem %s30_s21, 64  ;;  %p115_p12 = scmp.lt.s32.totalorder %s30_s21, %s30_s21 }
  0x1a   :  { %p111_p11 = scmp.ne.s32.totalorder %s30_s21, %s110_s14  ;;  %p116_p13 = scmp.lt.s32.totalorder %s110_s14, %s110_s14 }
  0x1c   :  { %p117_p0 = por %p116_p13, %p115_p12 }
  0x1e   :  { %p118_p1 = pnand %p117_p0, %p111_p11 }
  0x20   :  { %121 = shalt.err (!%p118_p1)
}
  0x21   :  { %32 = dma.hbm_to_vmem [thread:$0]  %s229_s1, 64, %s30_s21, [#allocation6]  }
  0x22   :  { %144 = dma.done.wait [#allocation3], 64  }
  0x23   :  { %145 = vsyncadd [#allocation3], 4294967232 }
  0x24   :  { %146 = dma.done.wait [#allocation6], 64  }
  0x25   :  { %147 = vsyncadd [#allocation6], 4294967232  ;;  %v46_v0 = vld [vmem:[#allocation5] sm:$0xf]  ;;  %v47_v1 = vld [vmem:[%s230_s2] sm:$0xf]  ;;  %v54_v5 = vlaneseq }
  0x26   :  { %v45_v2 = vld [vmem:[#allocation2] sm:$0xf]  ;;  %s152_s1 = smov [#allocation7]  }
  0x27   :  { %v48_v3 = vld [vmem:[%s231_s3] sm:$0xf]  ;;  %s65_s21 = sshll.u32 %s152_s1, 4  ;;  %vm56_vm0 = vcmp.lt.s32.totalorder %v54_v5, 512  ;;  %s66_s21 = int_to_ptr.vmem [resolvable:$true] %s65_s21 }
  0x28   :  { %v49_v4 = vld [vmem:[%s232_s4] sm:$0xf]  ;;  %v50_v6 = vmul.f32 %v48_v3, %v47_v1  ;;  %s122_s2 = scalar_lea.vmem %s66_s21, 64  ;;  %p127_p3 = scmp.lt.s32.totalorder %s66_s21, %s66_s21 }
  0x29   :  { %v52_v7 = vmul.f32 %v49_v4, %v46_v0  ;;  %p123_p2 = scmp.ne.s32.totalorder %s66_s21, %s122_s2  ;;  %p128_p4 = scmp.lt.s32.totalorder %s122_s2, %s122_s2 }
  0x2a   :  { %v51_v8 = vmul.f32 %v50_v6, %v45_v2 }
  0x2b   :  { %p129_p5 = por %p128_p4, %p127_p3 }
  0x2c   :  { %v53_v9 = vadd.f32 %v52_v7, %v51_v8 }
  0x2d   :  { %p130_p6 = pnand %p129_p5, %p123_p2 }
  0x2e   :  { %58 = vst.msk [vmem:[#allocation7] sm:$0xf] %vm56_vm0, %v53_v9 }
  0x2f   :  { %133 = shalt.err (!%p130_p6)
}
  0x30   :  { %s134_s4 = scalar_lea.hbm %s233_s5, 64 }
  0x31   :  { %p135_p7 = scmp.ne.s32.totalorder %s233_s5, %s134_s4  ;;  %p138_p8 = scmp.lt.u32.totalorder %s134_s4, %s233_s5 }
  0x33   :  { %p140_p9 = pnand %p138_p8, %p135_p7 }
  0x35   :  { %143 = shalt.err (!%p140_p9)
}
  0x36   :  { %68 = dma.vmem_to_hbm [thread:$0]  %s66_s21, 64, %s233_s5, [#allocation4]  }
  0x37   :  { %148 = dma.done.wait [#allocation4], 64  }
  0x38   :  { %149 = vsyncadd [#allocation4], 4294967232 }
  0x39   :  { %72 = vsyncpa [#allocation3], 1 }
  0x3a   :  { %73 = vsyncpa [#allocation6], 1 }
  0x3b   :  { %74 = vsyncpa [#allocation4], 1 }

</bundles_post_ra>
